<compile_context>
chip_gen: v5e
topology: v5e:2x2
jax: 0.10.0
libtpu: 0.0.40
codegen_flags: <defaults>
</compile_context>

<pallas_src>
import functools
import math

import jax
import jax.numpy as jnp
from jax import lax
from jax.experimental import pallas as pl
from jax.experimental.pallas import tpu as pltpu


def _largest_tile(n, cap, mult):
    """Largest multiple of `mult` that divides `n` and is <= `cap` (None if none)."""
    best = None
    d = mult
    while d <= min(cap, n):
        if n % d == 0:
            best = d
        d += mult
    return best


def _vmem_limit_bytes():
    """Scoped-VMEM budget sized from the actual part (64 MiB v7x, 128 MiB v5e/v6e)."""
    try:
        cap = int(pltpu.get_tpu_info().vmem_capacity_bytes)
    except Exception:
        cap = 64 * 1024 * 1024
    return int(min(cap * 3 // 4, 100 * 1024 * 1024))


# ---------------------------------------------------------------------------
# Kernel 1: L2-normalize one row block of BOTH views, fold in 1/sqrt(T), emit
#   z   : (2, tb, D)  bf16   (z_flat @ z_flat.T == sim / T directly)
#   pos : (2, tb, 1)  f32    (positives / T, computed in f32 -> exact wrt ref)
# Grid = (row block,).
# ---------------------------------------------------------------------------
def _normalize_kernel(ei_ref, ej_ref, z_ref, pos_ref, *, inv_sqrt_t):
    xi = ei_ref[...].astype(jnp.float32)
    xj = ej_ref[...].astype(jnp.float32)
    # x / max(||x||, 1e-12) == x * rsqrt(max(||x||^2, 1e-24))  (EUP rsqrt, no divide)
    zi = xi * (lax.rsqrt(jnp.maximum(jnp.sum(xi * xi, axis=1, keepdims=True), 1e-24))
               * inv_sqrt_t)
    zj = xj * (lax.rsqrt(jnp.maximum(jnp.sum(xj * xj, axis=1, keepdims=True), 1e-24))
               * inv_sqrt_t)
    z_ref[0] = zi.astype(z_ref.dtype)
    z_ref[1] = zj.astype(z_ref.dtype)
    p = jnp.sum(zi * zj, axis=1, keepdims=True)  # positives / T (same for both views)
    pos_ref[0] = p
    pos_ref[1] = p


# ---------------------------------------------------------------------------
# Kernel 2: tiled NT-Xent.
# Grid = (row blocks [parallel], column blocks [arbitrary/reduction]).
#   acc += lane-folded exp(z_q @ z_k^T)          (VPU only, per column block)
# On the last column block:
#   diag/T = rowsum(q_bf16^2)  (matches the MXU-computed self-similarity)
#   loss_row = -pos/T + log(rowsum(acc) - exp(diag/T))
# ---------------------------------------------------------------------------
def _ntxent_kernel(zq_ref, zk_ref, pos_ref, loss_ref, acc_ref, *, lane_groups):
    j = pl.program_id(1)

    @pl.when(j == 0)
    def _():
        acc_ref[...] = jnp.zeros_like(acc_ref)

    q = zq_ref[0]  # (tq, D) bf16, normalized and scaled by 1/sqrt(T)
    k = zk_ref[0]  # (tk, D) bf16
    # bf16 x bf16 -> f32 accumulate: full-rate MXU on v5e/v6e/v7x.
    sim = lax.dot_general(
        q, k, (((1,), (1,)), ((), ())),
        preferred_element_type=jnp.float32,
    )  # (tq, tk) == sim / T
    e = jnp.exp(sim)

    if lane_groups > 0:
        # Lane-dense accumulation: fold the tk/128 lane groups with VPU adds;
        # defer the XLU cross-lane reduce + narrow store to the last j block.
        part = e[:, 0:128]
        for g in range(1, lane_groups):
            part = part + e[:, g * 128:(g + 1) * 128]
        acc_ref[...] += part
    else:
        acc_ref[...] += jnp.sum(e, axis=1, keepdims=True)

    @pl.when(j == pl.num_programs(1) - 1)
    def _():
        qf = q.astype(jnp.float32)
        # Diagonal from the same bf16-rounded q so it cancels the MXU term.
        diag = jnp.sum(qf * qf, axis=1, keepdims=True)           # self-sim / T
        if lane_groups > 0:
            denom = jnp.sum(acc_ref[...], axis=1, keepdims=True)  # single XLU reduce
        else:
            denom = acc_ref[...]
        loss_ref[0] = -pos_ref[0] + jnp.log(denom - jnp.exp(diag))


def contrastive_loss(emb_i, emb_j, temperature=0.5):
    """NT-Xent loss matching the PyTorch ContrastiveLoss.forward()."""
    assert emb_i.shape == emb_j.shape and emb_i.ndim == 2
    n, d = emb_i.shape
    inv_sqrt_t = float(1.0 / math.sqrt(float(temperature)))
    vmem_limit = _vmem_limit_bytes()

    # ---- pass 1: normalized, temperature-folded reps (2,N,D) bf16 + positives ----
    tb = _largest_tile(n, 512, 8) or n
    nbh = n // tb
    z, pos = pl.pallas_call(
        functools.partial(_normalize_kernel, inv_sqrt_t=inv_sqrt_t),
        out_shape=(jax.ShapeDtypeStruct((2, n, d), jnp.bfloat16),
                   jax.ShapeDtypeStruct((2, n, 1), jnp.float32)),
        grid=(nbh,),
        in_specs=[
            pl.BlockSpec((tb, d), lambda b: (b, 0)),
            pl.BlockSpec((tb, d), lambda b: (b, 0)),
        ],
        out_specs=[
            pl.BlockSpec((2, tb, d), lambda b: (0, b, 0)),
            pl.BlockSpec((2, tb, 1), lambda b: (0, b, 0)),
        ],
        compiler_params=pltpu.CompilerParams(
            dimension_semantics=("parallel",),
            vmem_limit_bytes=vmem_limit),
    )(emb_i, emb_j)

    # ---- pass 2: tiled NT-Xent over the (2N, 2N) similarity ----
    tq = _largest_tile(n, 512, 8) or n
    hq = n // tq
    nq = 2 * hq                       # always even -> both TCs loaded on v7x
    # tk cap per generation: 2048 on 64 MiB-VMEM parts (v7x), 4096 on 128 MiB
    # parts (v5e/v6e); prefer multiples of 256 for full MXU N-dim occupancy.
    tk_cap = 2048 if vmem_limit <= 48 * 1024 * 1024 else 4096
    tk = (_largest_tile(n, tk_cap, 256) or _largest_tile(n, tk_cap, 128)
          or _largest_tile(n, tk_cap, 8) or n)
    hk = n // tk
    nk = 2 * hk
    lane_groups = tk // 128 if tk % 128 == 0 else 0

    n2 = 2 * n
    cost = pl.CostEstimate(
        flops=int(2 * n2 * n2 * d),
        transcendentals=int(n2 * n2 + n2),
        bytes_accessed=int(2 * n2 * d * (nq + 1) + 2 * n2 * d + 4 * n2 * 2),
    )

    loss_rows = pl.pallas_call(
        functools.partial(_ntxent_kernel, lane_groups=lane_groups),
        out_shape=jax.ShapeDtypeStruct((2, n, 1), jnp.float32),
        grid=(nq, nk),
        in_specs=[
            pl.BlockSpec((1, tq, d), lambda i, j: (i // hq, i % hq, 0)),  # q rows
            pl.BlockSpec((1, tk, d), lambda i, j: (j // hk, j % hk, 0)),  # k rows
            pl.BlockSpec((1, tq, 1), lambda i, j: (i // hq, i % hq, 0)),  # positives/T
        ],
        out_specs=pl.BlockSpec((1, tq, 1), lambda i, j: (i // hq, i % hq, 0)),
        scratch_shapes=[pltpu.VMEM((tq, 128 if lane_groups > 0 else 1), jnp.float32)],
        compiler_params=pltpu.CompilerParams(
            dimension_semantics=("parallel", "arbitrary"),
            vmem_limit_bytes=vmem_limit),
        cost_estimate=cost,
    )(z, z, pos)

    # Tiny final mean over 2N per-row losses stays in plain JAX so the row axis
    # can remain "parallel" across TensorCores.
    return jnp.sum(loss_rows) / n2


def _reference_loss(emb_i, emb_j, temperature=0.5):
    """Pure-JAX reference mirroring the PyTorch module (f32 throughout)."""
    n = emb_i.shape[0]
    z_i = emb_i / jnp.maximum(jnp.linalg.norm(emb_i, axis=1, keepdims=True), 1e-12)
    z_j = emb_j / jnp.maximum(jnp.linalg.norm(emb_j, axis=1, keepdims=True), 1e-12)
    reps = jnp.concatenate([z_i, z_j], axis=0)
    sim = jnp.matmul(reps, reps.T, precision=lax.Precision.HIGHEST)
    sim_ij = jnp.diagonal(sim, offset=n)
    sim_ji = jnp.diagonal(sim, offset=-n)
    positives = jnp.concatenate([sim_ij, sim_ji], axis=0)
    neg_mask = 1.0 - jnp.eye(2 * n, dtype=jnp.float32)
    nominator = jnp.exp(positives / temperature)
    denominator = jnp.sum(neg_mask * jnp.exp(sim / temperature), axis=1)
    loss_partial = -jnp.log(nominator / denominator)
    return jnp.sum(loss_partial) / (2 * n)


if __name__ == "__main__":
    batch_size = 8     # N  -> 2N = 16 rows
    dim = 128          # embedding dim (lane axis)
    temperature = 0.5

    key = jax.random.PRNGKey(0)
    ki, kj = jax.random.split(key)
    emb_i = jax.random.normal(ki, (batch_size, dim), dtype=jnp.float32)
    emb_j = jax.random.normal(kj, (batch_size, dim), dtype=jnp.float32)

    loss = jax.block_until_ready(contrastive_loss(emb_i, emb_j, temperature))
    ref = jax.block_until_ready(_reference_loss(emb_i, emb_j, temperature))

    # Positives are f32-exact; only the negative similarities go through the
    # bf16 MXU, so a 1e-3 tolerance is comfortable.
    assert jnp.allclose(loss, ref, atol=1e-3, rtol=1e-3), (loss, ref)
    print("KERNEL_OK")
</pallas_src>

<mosaic_0001>
module attributes {stable_mosaic.version = 11 : i64} {
  func.func @_normalize_kernel(%arg0: i32, %arg1: memref<8x128xf32, #tpu.memory_space<vmem>>, %arg2: memref<8x128xf32, #tpu.memory_space<vmem>>, %arg3: memref<2x8x128xbf16, #tpu.memory_space<vmem>>, %arg4: memref<2x8x1xf32, #tpu.memory_space<vmem>>) attributes {dimension_semantics = [#tpu.dimension_semantics<parallel>], iteration_bounds = array<i64: 1>, scalar_prefetch = 0 : i64, scratch_operands = 0 : i64, tpu.core_type = #tpu.core_type<tc>, window_params = [{transform_indices = @transform_0, window_bounds = array<i64: 8, 128>}, {transform_indices = @transform_1, window_bounds = array<i64: 8, 128>}, {transform_indices = @transform_2, window_bounds = array<i64: 2, 8, 128>}, {transform_indices = @transform_3, window_bounds = array<i64: 2, 8, 1>}]} {
    %c0 = arith.constant 0 : index
    %c0_0 = arith.constant 0 : index
    %0 = vector.load %arg1[%c0, %c0_0] : memref<8x128xf32, #tpu.memory_space<vmem>>, vector<8x128xf32>
    %c0_1 = arith.constant 0 : index
    %c0_2 = arith.constant 0 : index
    %1 = vector.load %arg2[%c0_1, %c0_2] : memref<8x128xf32, #tpu.memory_space<vmem>>, vector<8x128xf32>
    %2 = arith.mulf %0, %0 : vector<8x128xf32>
    %cst = arith.constant dense<0.000000e+00> : vector<8xf32>
    %3 = vector.multi_reduction <add>, %2, %cst [1] : vector<8x128xf32> to vector<8xf32>
    %4 = vector.shape_cast %3 : vector<8xf32> to vector<8x1xf32>
    %cst_3 = arith.constant 1.000000e-24 : f32
    %5 = vector.broadcast %cst_3 : f32 to vector<8x1xf32>
    %6 = arith.maximumf %4, %5 : vector<8x1xf32>
    %7 = math.rsqrt %6 : vector<8x1xf32>
    %cst_4 = arith.constant 1.41421354 : f32
    %8 = vector.broadcast %cst_4 : f32 to vector<8x1xf32>
    %9 = arith.mulf %7, %8 : vector<8x1xf32>
    %10 = vector.broadcast %9 : vector<8x1xf32> to vector<8x128xf32>
    %11 = arith.mulf %0, %10 : vector<8x128xf32>
    %12 = arith.mulf %1, %1 : vector<8x128xf32>
    %cst_5 = arith.constant dense<0.000000e+00> : vector<8xf32>
    %13 = vector.multi_reduction <add>, %12, %cst_5 [1] : vector<8x128xf32> to vector<8xf32>
    %14 = vector.shape_cast %13 : vector<8xf32> to vector<8x1xf32>
    %cst_6 = arith.constant 1.000000e-24 : f32
    %15 = vector.broadcast %cst_6 : f32 to vector<8x1xf32>
    %16 = arith.maximumf %14, %15 : vector<8x1xf32>
    %17 = math.rsqrt %16 : vector<8x1xf32>
    %cst_7 = arith.constant 1.41421354 : f32
    %18 = vector.broadcast %cst_7 : f32 to vector<8x1xf32>
    %19 = arith.mulf %17, %18 : vector<8x1xf32>
    %20 = vector.broadcast %19 : vector<8x1xf32> to vector<8x128xf32>
    %21 = arith.mulf %1, %20 : vector<8x128xf32>
    %22 = arith.truncf %11 : vector<8x128xf32> to vector<8x128xbf16>
    %c0_8 = arith.constant 0 : index
    %c0_9 = arith.constant 0 : index
    %c0_10 = arith.constant 0 : index
    %23 = vector.load %arg3[%c0_8, %c0_9, %c0_10] : memref<2x8x128xbf16, #tpu.memory_space<vmem>>, vector<1x8x128xbf16>
    %24 = vector.shape_cast %23 : vector<1x8x128xbf16> to vector<8x128xbf16>
    %25 = vector.shape_cast %22 : vector<8x128xbf16> to vector<1x8x128xbf16>
    tpu.vector_store %arg3[%c0_8, %c0_9, %c0_10], %25 {strides = array<i32>} : memref<2x8x128xbf16, #tpu.memory_space<vmem>>, vector<1x8x128xbf16>,
    %26 = arith.truncf %21 : vector<8x128xf32> to vector<8x128xbf16>
    %c1 = arith.constant 1 : index
    %c0_11 = arith.constant 0 : index
    %c0_12 = arith.constant 0 : index
    %27 = vector.load %arg3[%c1, %c0_11, %c0_12] : memref<2x8x128xbf16, #tpu.memory_space<vmem>>, vector<1x8x128xbf16>
    %28 = vector.shape_cast %27 : vector<1x8x128xbf16> to vector<8x128xbf16>
    %29 = vector.shape_cast %26 : vector<8x128xbf16> to vector<1x8x128xbf16>
    tpu.vector_store %arg3[%c1, %c0_11, %c0_12], %29 {strides = array<i32>} : memref<2x8x128xbf16, #tpu.memory_space<vmem>>, vector<1x8x128xbf16>,
    %30 = arith.mulf %11, %21 : vector<8x128xf32>
    %cst_13 = arith.constant dense<0.000000e+00> : vector<8xf32>
    %31 = vector.multi_reduction <add>, %30, %cst_13 [1] : vector<8x128xf32> to vector<8xf32>
    %32 = vector.shape_cast %31 : vector<8xf32> to vector<8x1xf32>
    %c0_14 = arith.constant 0 : index
    %c0_15 = arith.constant 0 : index
    %c0_16 = arith.constant 0 : index
    %33 = vector.load %arg4[%c0_14, %c0_15, %c0_16] : memref<2x8x1xf32, #tpu.memory_space<vmem>>, vector<1x8x1xf32>
    %34 = vector.shape_cast %33 : vector<1x8x1xf32> to vector<8x1xf32>
    %35 = vector.shape_cast %32 : vector<8x1xf32> to vector<1x8x1xf32>
    tpu.vector_store %arg4[%c0_14, %c0_15, %c0_16], %35 {strides = array<i32>} : memref<2x8x1xf32, #tpu.memory_space<vmem>>, vector<1x8x1xf32>,
    %c1_17 = arith.constant 1 : index
    %c0_18 = arith.constant 0 : index
    %c0_19 = arith.constant 0 : index
    %36 = vector.load %arg4[%c1_17, %c0_18, %c0_19] : memref<2x8x1xf32, #tpu.memory_space<vmem>>, vector<1x8x1xf32>
    %37 = vector.shape_cast %36 : vector<1x8x1xf32> to vector<8x1xf32>
    %38 = vector.shape_cast %32 : vector<8x1xf32> to vector<1x8x1xf32>
    tpu.vector_store %arg4[%c1_17, %c0_18, %c0_19], %38 {strides = array<i32>} : memref<2x8x1xf32, #tpu.memory_space<vmem>>, vector<1x8x1xf32>,
    return
  }
  func.func @transform_0(%arg0: i32) -> (i32, i32) {
    %c0_i32 = arith.constant 0 : i32
    %c0_i32_0 = arith.constant 0 : i32
    return %arg0, %c0_i32 : i32, i32
  }
  func.func @transform_1(%arg0: i32) -> (i32, i32) {
    %c0_i32 = arith.constant 0 : i32
    %c0_i32_0 = arith.constant 0 : i32
    return %arg0, %c0_i32 : i32, i32
  }
  func.func @transform_2(%arg0: i32) -> (i32, i32, i32) {
    %c0_i32 = arith.constant 0 : i32
    %c0_i32_0 = arith.constant 0 : i32
    %c0_i32_1 = arith.constant 0 : i32
    return %c0_i32, %arg0, %c0_i32_0 : i32, i32, i32
  }
  func.func @transform_3(%arg0: i32) -> (i32, i32, i32) {
    %c0_i32 = arith.constant 0 : i32
    %c0_i32_0 = arith.constant 0 : i32
    %c0_i32_1 = arith.constant 0 : i32
    return %c0_i32, %arg0, %c0_i32_0 : i32, i32, i32
  }
}

</mosaic_0001>

<bundles_post_ra>
// kernel: tpu_custom_call.1
= control target key start
LH: loop header
LB: loop body
LE: loop exit
PB: predicated region body
PF: predicated region fallthrough
CT: control target
= control target key end

     0   :  { %9 = vsyncpa [#allocation3], 0  ;;  %s245_s0 = inlined_call_operand.hbm [shape: f32[8,128], index: 0, kind: input, shape index: {}]   ;;  %s246_s1 = inlined_call_operand.hbm [shape: f32[8,128], index: 1, kind: input, shape index: {}]   ;;  %s247_s2 = inlined_call_operand.hbm [shape: bf16[2,8,128], index: 2, kind: output, shape index: {0}]   ;;  %s248_s3 = inlined_call_operand.vmem [shape: f32[2,8,1], index: 3, kind: output, shape index: {1}]  }
   0x1   :  { %10 = vsyncpa [#allocation6], 0 }
   0x2   :  { %11 = vsyncpa [#allocation4], 0  ;;  %s17_s14 = sshll.u32 %s245_s0, 4  ;;  %s205_s15 = smov [#allocation2]   ;;  %s18_s14 = int_to_ptr.hbm [resolvable:$true] %s17_s14 }
   0x3   :  { %s19_s16 = sshll.u32 %s205_s15, 4  ;;  %s28_s19 = sshll.u32 %s246_s1, 4  ;;  %s20_s16 = int_to_ptr.vmem [resolvable:$true] %s19_s16  ;;  %s29_s19 = int_to_ptr.hbm [resolvable:$true] %s28_s19 }
   0x4   :  { %22 = dma.hbm_to_vmem [thread:$0]  %s18_s14, 128, %s20_s16, [#allocation3]  }
   0x5   :  { %s206_s20 = smov [#allocation5]  }
   0x6   :  { %s30_s21 = sshll.u32 %s206_s20, 4  ;;  %s31_s21 = int_to_ptr.vmem [resolvable:$true] %s30_s21 }
   0x7   :  { %33 = dma.hbm_to_vmem [thread:$0]  %s29_s19, 128, %s31_s21, [#allocation6]  }
   0x8   :  { %199 = dma.done.wait [#allocation3], 128  }
   0x9   :  { %200 = vsyncadd [#allocation3], 4294967168 }
   0xa   :  { %201 = dma.done.wait [#allocation6], 128  }
   0xb   :  { %202 = vsyncadd [#allocation6], 4294967168  ;;  %v42_v0 = vld [vmem:[#allocation2] sm:$0xff]  ;;  %v43_v2 = vld [vmem:[#allocation5] sm:$0xff]  ;;  %s207_s0 = smov [#allocation7]   ;;  %s94_s24 = sshll.u32 %s247_s2, 4  ;;  %s95_s24 = int_to_ptr.hbm [resolvable:$true] %s94_s24 }
   0xc   :  { %v44_v1 = vmul.f32 %v42_v0, %v42_v0  ;;  %v60_v3 = vmul.f32 %v43_v2, %v43_v2  ;;  %s92_s1 = sshll.u32 %s207_s0, 4  ;;  %s208_s25 = smov 64   ;;  %vm84_vm6 = vcmask 7168   ;;  %s93_s1 = int_to_ptr.vmem [resolvable:$true] %s92_s1 }
   0xd   :  { %s209_s26 = smov 4  }
   0xe   :  { %45 = vadd.xlane.f32.xlu0 %v44_v1 }
  0x16   :  { %61 = vadd.xlane.f32.xlu0 %v60_v3 }
  0x81   :  { %v46_v4 = vpop.xlane.xlu0 %45 }
  0x82   :  { %v47_v5 = vmax.f32 %v46_v4, 1e-24 }
  0x84   :  { %123 = vrsqrt.f32 %v47_v5  ;;  %vm54_vm1 = vweird.f32 %v47_v5 }
  0x89   :  { %v62_v6 = vpop.xlane.xlu0 %61 }
  0x8a   :  { %v124_v7 = vpop.eup %123  ;;  %v63_v8 = vmax.f32 %v62_v6, 1e-24 }
  0x8b   :  { %v49_v9 = vmul.f32 %v124_v7, %v47_v5  ;;  %vm55_vm0 = vweird.f32 %v124_v7 }
  0x8c   :  { %125 = vrsqrt.f32 %v63_v8  ;;  %vm56_vm2 = vmor %vm54_vm1, %vm55_vm0  ;;  %vm70_vm4 = vweird.f32 %v63_v8 }
  0x8d   :  { %v50_v10 = vmul.f32 %v124_v7, %v49_v9 }
  0x8f   :  { %v51_v11 = vmul.f32 0.5, %v50_v10 }
  0x91   :  { %v52_v12 = vsub.f32 1.5, %v51_v11 }
  0x92   :  { %v126_v13 = vpop.eup %125 }
  0x93   :  { %v65_v14 = vmul.f32 %v126_v13, %v63_v8  ;;  %v53_v16 = vmul.f32 %v124_v7, %v52_v12  ;;  %vm71_vm3 = vweird.f32 %v126_v13 }
  0x94   :  { %vm72_vm5 = vmor %vm70_vm4, %vm71_vm3 }
  0x95   :  { %v66_v15 = vmul.f32 %v126_v13, %v65_v14  ;;  %v57_v19 = vsel %vm56_vm2, %v124_v7, %v53_v16 }
  0x96   :  { %v58_v21 = vmul.f32 1.4142135, %v57_v19 }
  0x97   :  { %v67_v17 = vmul.f32 0.5, %v66_v15 }
  0x98   :  { %v59_v24 = vmul.f32 %v58_v21, %v42_v0 }
  0x99   :  { %v68_v18 = vsub.f32 1.5, %v67_v17 }
  0x9b   :  { %v69_v20 = vmul.f32 %v126_v13, %v68_v18 }
  0x9d   :  { %v73_v22 = vsel %vm72_vm5, %v126_v13, %v69_v20 }
  0x9e   :  { %v74_v23 = vmul.f32 1.4142135, %v73_v22 }
  0xa0   :  { %v75_v25 = vmul.f32 %v74_v23, %v43_v2 }
  0xa2   :  { %v81_v26 = vmul.f32 %v75_v25, %v59_v24  ;;  %v116_v27 = vpack.c.bf16 %v75_v25, %v59_v24 }
  0xa4   :  { %82 = vadd.xlane.f32.xlu1 %v81_v26  ;;  %117 = vst [vmem:[#allocation7] sm:$0xff] %v116_v27  }
  0xa5   :  { %100 = dma.vmem_to_hbm [thread:$0]  %s93_s1, 128, %s95_s24, [#allocation4], %s208_s25, %s208_s25, %s209_s26  }
 0x117   :  { %v83_v28 = vpop.xlane.xlu1 %82 }
 0x118   :  { %85 = vst.msk [vmem:[%s248_s3] sm:$0xff] %vm84_vm6, %v83_v28 }
 0x119   :  { %112 = vst.msk [vmem:[%s248_s3 + $0x8] sm:$0xff] %vm84_vm6, %v83_v28 }
 0x11a   :  { %203 = dma.done.wait [#allocation4], 128  }
 0x11b   :  { %204 = vsyncadd [#allocation4], 4294967168 }
 0x11c   :  { %109 = vsyncpa [#allocation3], 1 }
 0x11d   :  { %110 = vsyncpa [#allocation6], 1 }
 0x11e   :  { %111 = vsyncpa [#allocation4], 1 }

</bundles_post_ra>
